<compile_context>
chip_gen: v7x
topology: tpu7x:2x2x1
jax: 0.10.0
libtpu: 0.0.40
codegen_flags: <defaults>
</compile_context>

<pallas_src>
import jax
import jax.numpy as jnp
from jax.experimental import pallas as pl
from jax.experimental.pallas import tpu as pltpu


def _round_up(x, m):
    return ((x + m - 1) // m) * m


def _qfunction_kernel(x_ref, w1_ref, b1_ref, w2_ref, b2_ref, w3_ref, b3_ref,
                      out_ref):
    # Fused forward for one batch tile: three MXU matmuls (f32 accumulation),
    # bias adds + ReLUs on the VPU, everything resident in VMEM.
    x = x_ref[...]

    h1 = jnp.dot(x, w1_ref[...], preferred_element_type=jnp.float32)
    h1 = jnp.maximum(h1 + b1_ref[...], 0.0)          # [TB, H], ReLU

    h2 = jnp.dot(h1, w2_ref[...], preferred_element_type=jnp.float32)
    h2 = jnp.maximum(h2 + b2_ref[...], 0.0)          # [TB, H], ReLU

    # w3/b3 are pre-padded to 128 lanes -> full-width, unmasked store.
    y = jnp.dot(h2, w3_ref[...], preferred_element_type=jnp.float32)
    y = y + b3_ref[...]                               # [TB, 128]

    out_ref[...] = y.astype(out_ref.dtype)


def qfunction_forward(x, w1, b1, w2, b2, w3, b3):
    """x: [B, input_size]; weights as [in, out]; biases as [1, out].

    Returns [B, num_classes] (identical semantics to the PyTorch module).
    """
    B, in_size = x.shape
    H = w1.shape[1]
    num_classes = w3.shape[1]

    # ---- Lane-dense output: pad final layer to a multiple of 128 lanes. ----
    n_pad = max(128, _round_up(num_classes, 128))
    w3p = jnp.zeros((H, n_pad), w3.dtype).at[:, :num_classes].set(w3)
    b3p = jnp.zeros((1, n_pad), b3.dtype).at[:, :num_classes].set(b3)

    # ---- Batch tiling: stream x/out over the grid, keep weights resident. ---
    # Tile must be a multiple of 8 sublanes; cap it so big RL batches pipeline.
    tb = min(512, _round_up(B, 8))
    b_pad = _round_up(B, tb)
    if b_pad != B:
        x = jnp.pad(x, ((0, b_pad - B), (0, 0)))
    grid = (b_pad // tb,)

    out = pl.pallas_call(
        _qfunction_kernel,
        out_shape=jax.ShapeDtypeStruct((b_pad, n_pad), jnp.float32),
        grid_spec=pltpu.PrefetchScalarGridSpec(
            num_scalar_prefetch=0,
            grid=grid,
            in_specs=[
                # Activations: streamed per batch tile (pipelined DMA).
                pl.BlockSpec((tb, in_size), lambda i: (i, 0)),
                # Weights / biases: constant index_map -> VMEM-resident.
                pl.BlockSpec(w1.shape, lambda i: (0, 0)),
                pl.BlockSpec(b1.shape, lambda i: (0, 0)),
                pl.BlockSpec(w2.shape, lambda i: (0, 0)),
                pl.BlockSpec(b2.shape, lambda i: (0, 0)),
                pl.BlockSpec((H, n_pad), lambda i: (0, 0)),
                pl.BlockSpec((1, n_pad), lambda i: (0, 0)),
            ],
            out_specs=pl.BlockSpec((tb, n_pad), lambda i: (i, 0)),
        ),
        compiler_params=pltpu.CompilerParams(
            # Batch tiles are independent -> shard across TCs on v7x.
            dimension_semantics=("parallel",),
            # Explicit budget that fits v7x's 64 MiB VMEM as well as v5e/v6e.
            vmem_limit_bytes=32 * 1024 * 1024,
        ),
    )(x, w1, b1, w2, b2, w3p, b3p)

    # Strip batch and lane padding back to the module's true output shape.
    return out[:B, :num_classes]


def init_params(key, input_size, hidden_size, num_classes):
    """Deterministic synthetic init (PyTorch-Linear-like uniform ranges)."""
    keys = jax.random.split(key, 6)

    def linear_init(kw, kb, fan_in, fan_out):
        bound = 1.0 / jnp.sqrt(jnp.float32(fan_in))
        w = jax.random.uniform(kw, (fan_in, fan_out), jnp.float32, -bound, bound)
        b = jax.random.uniform(kb, (1, fan_out), jnp.float32, -bound, bound)
        return w, b

    # TODO(synk): for scaled-up shapes (H >= 128, large B) store w1/w2/w3 in
    # bfloat16 and keep f32 accumulation; at CartPole scale f32 is fine.
    w1, b1 = linear_init(keys[0], keys[1], input_size, hidden_size)
    w2, b2 = linear_init(keys[2], keys[3], hidden_size, hidden_size)
    w3, b3 = linear_init(keys[4], keys[5], hidden_size, num_classes)
    return w1, b1, w2, b2, w3, b3


if __name__ == "__main__":
    # CartPole-ish shapes: 4 state dims, 32 hidden units, 2 actions, batch 8.
    batch, input_size, hidden_size, num_classes = 8, 4, 32, 2

    key = jax.random.PRNGKey(0)
    k_x, k_p = jax.random.split(key)

    x = jax.random.normal(k_x, (batch, input_size), jnp.float32)
    params = init_params(k_p, input_size, hidden_size, num_classes)

    out = qfunction_forward(x, *params)
    out = jax.block_until_ready(out)

    # Pure-JAX reference for sanity.
    w1, b1, w2, b2, w3, b3 = params
    ref = jnp.maximum(x @ w1 + b1, 0.0)
    ref = jnp.maximum(ref @ w2 + b2, 0.0)
    ref = ref @ w3 + b3

    assert out.shape == (batch, num_classes)
    assert jnp.allclose(out, ref, atol=1e-5, rtol=1e-5)
    print("KERNEL_OK")
</pallas_src>

<mosaic_0001>
module attributes {stable_mosaic.version = 11 : i64} {
  func.func @_qfunction_kernel(%arg0: i32, %arg1: memref<8x4xf32, #tpu.memory_space<vmem>>, %arg2: memref<4x32xf32, #tpu.memory_space<vmem>>, %arg3: memref<1x32xf32, #tpu.memory_space<vmem>>, %arg4: memref<32x32xf32, #tpu.memory_space<vmem>>, %arg5: memref<1x32xf32, #tpu.memory_space<vmem>>, %arg6: memref<32x128xf32, #tpu.memory_space<vmem>>, %arg7: memref<1x128xf32, #tpu.memory_space<vmem>>, %arg8: memref<8x128xf32, #tpu.memory_space<vmem>>) attributes {dimension_semantics = [#tpu.dimension_semantics<parallel>], iteration_bounds = array<i64: 1>, scalar_prefetch = 0 : i64, scratch_operands = 0 : i64, tpu.core_type = #tpu.core_type<tc>, window_params = [{transform_indices = @transform_0, window_bounds = array<i64: 8, 4>}, {pipeline_mode = #tpu.pipeline_mode<synchronous>, transform_indices = @transform_1, window_bounds = array<i64: 4, 32>}, {pipeline_mode = #tpu.pipeline_mode<synchronous>, transform_indices = @transform_2, window_bounds = array<i64: 1, 32>}, {pipeline_mode = #tpu.pipeline_mode<synchronous>, transform_indices = @transform_3, window_bounds = array<i64: 32, 32>}, {pipeline_mode = #tpu.pipeline_mode<synchronous>, transform_indices = @transform_4, window_bounds = array<i64: 1, 32>}, {pipeline_mode = #tpu.pipeline_mode<synchronous>, transform_indices = @transform_5, window_bounds = array<i64: 32, 128>}, {pipeline_mode = #tpu.pipeline_mode<synchronous>, transform_indices = @transform_6, window_bounds = array<i64: 1, 128>}, {transform_indices = @transform_7, window_bounds = array<i64: 8, 128>}]} {
    %c0 = arith.constant 0 : index
    %c0_0 = arith.constant 0 : index
    %0 = vector.load %arg1[%c0, %c0_0] : memref<8x4xf32, #tpu.memory_space<vmem>>, vector<8x4xf32>
    %c0_1 = arith.constant 0 : index
    %c0_2 = arith.constant 0 : index
    %1 = vector.load %arg2[%c0_1, %c0_2] : memref<4x32xf32, #tpu.memory_space<vmem>>, vector<4x32xf32>
    %cst = arith.constant dense<0.000000e+00> : vector<8x32xf32>
    %2 = tpu.matmul %0, %1, %cst {dimension_numbers = #tpu.dot_dimension_numbers<[1], [0], [0], [1], [0, 0, 1, 1], [], []>} : vector<8x4xf32>, vector<4x32xf32>, vector<8x32xf32> -> vector<8x32xf32>
    %c0_3 = arith.constant 0 : index
    %c0_4 = arith.constant 0 : index
    %3 = vector.load %arg3[%c0_3, %c0_4] : memref<1x32xf32, #tpu.memory_space<vmem>>, vector<1x32xf32>
    %4 = vector.broadcast %3 : vector<1x32xf32> to vector<8x32xf32>
    %5 = arith.addf %2, %4 : vector<8x32xf32>
    %cst_5 = arith.constant 0.000000e+00 : f32
    %6 = vector.broadcast %cst_5 : f32 to vector<8x32xf32>
    %7 = arith.maximumf %5, %6 : vector<8x32xf32>
    %c0_6 = arith.constant 0 : index
    %c0_7 = arith.constant 0 : index
    %8 = vector.load %arg4[%c0_6, %c0_7] : memref<32x32xf32, #tpu.memory_space<vmem>>, vector<32x32xf32>
    %cst_8 = arith.constant dense<0.000000e+00> : vector<8x32xf32>
    %9 = tpu.matmul %7, %8, %cst_8 {dimension_numbers = #tpu.dot_dimension_numbers<[1], [0], [0], [1], [0, 0, 1, 1], [], []>} : vector<8x32xf32>, vector<32x32xf32>, vector<8x32xf32> -> vector<8x32xf32>
    %c0_9 = arith.constant 0 : index
    %c0_10 = arith.constant 0 : index
    %10 = vector.load %arg5[%c0_9, %c0_10] : memref<1x32xf32, #tpu.memory_space<vmem>>, vector<1x32xf32>
    %11 = vector.broadcast %10 : vector<1x32xf32> to vector<8x32xf32>
    %12 = arith.addf %9, %11 : vector<8x32xf32>
    %cst_11 = arith.constant 0.000000e+00 : f32
    %13 = vector.broadcast %cst_11 : f32 to vector<8x32xf32>
    %14 = arith.maximumf %12, %13 : vector<8x32xf32>
    %c0_12 = arith.constant 0 : index
    %c0_13 = arith.constant 0 : index
    %15 = vector.load %arg6[%c0_12, %c0_13] : memref<32x128xf32, #tpu.memory_space<vmem>>, vector<32x128xf32>
    %cst_14 = arith.constant dense<0.000000e+00> : vector<8x128xf32>
    %16 = tpu.matmul %14, %15, %cst_14 {dimension_numbers = #tpu.dot_dimension_numbers<[1], [0], [0], [1], [0, 0, 1, 1], [], []>} : vector<8x32xf32>, vector<32x128xf32>, vector<8x128xf32> -> vector<8x128xf32>
    %c0_15 = arith.constant 0 : index
    %c0_16 = arith.constant 0 : index
    %17 = vector.load %arg7[%c0_15, %c0_16] : memref<1x128xf32, #tpu.memory_space<vmem>>, vector<1x128xf32>
    %18 = vector.broadcast %17 : vector<1x128xf32> to vector<8x128xf32>
    %19 = arith.addf %16, %18 : vector<8x128xf32>
    %c0_17 = arith.constant 0 : index
    %c0_18 = arith.constant 0 : index
    %20 = vector.load %arg8[%c0_17, %c0_18] : memref<8x128xf32, #tpu.memory_space<vmem>>, vector<8x128xf32>
    tpu.vector_store %arg8[%c0_17, %c0_18], %19 {strides = array<i32>} : memref<8x128xf32, #tpu.memory_space<vmem>>, vector<8x128xf32>,
    return
  }
  func.func @transform_0(%arg0: i32) -> (i32, i32) {
    %c0_i32 = arith.constant 0 : i32
    %c0_i32_0 = arith.constant 0 : i32
    return %arg0, %c0_i32 : i32, i32
  }
  func.func @transform_1(%arg0: i32) -> (i32, i32) {
    %c0_i32 = arith.constant 0 : i32
    %c0_i32_0 = arith.constant 0 : i32
    %c0_i32_1 = arith.constant 0 : i32
    return %c0_i32, %c0_i32_0 : i32, i32
  }
  func.func @transform_2(%arg0: i32) -> (i32, i32) {
    %c0_i32 = arith.constant 0 : i32
    %c0_i32_0 = arith.constant 0 : i32
    %c0_i32_1 = arith.constant 0 : i32
    return %c0_i32, %c0_i32_0 : i32, i32
  }
  func.func @transform_3(%arg0: i32) -> (i32, i32) {
    %c0_i32 = arith.constant 0 : i32
    %c0_i32_0 = arith.constant 0 : i32
    %c0_i32_1 = arith.constant 0 : i32
    return %c0_i32, %c0_i32_0 : i32, i32
  }
  func.func @transform_4(%arg0: i32) -> (i32, i32) {
    %c0_i32 = arith.constant 0 : i32
    %c0_i32_0 = arith.constant 0 : i32
    %c0_i32_1 = arith.constant 0 : i32
    return %c0_i32, %c0_i32_0 : i32, i32
  }
  func.func @transform_5(%arg0: i32) -> (i32, i32) {
    %c0_i32 = arith.constant 0 : i32
    %c0_i32_0 = arith.constant 0 : i32
    %c0_i32_1 = arith.constant 0 : i32
    return %c0_i32, %c0_i32_0 : i32, i32
  }
  func.func @transform_6(%arg0: i32) -> (i32, i32) {
    %c0_i32 = arith.constant 0 : i32
    %c0_i32_0 = arith.constant 0 : i32
    %c0_i32_1 = arith.constant 0 : i32
    return %c0_i32, %c0_i32_0 : i32, i32
  }
  func.func @transform_7(%arg0: i32) -> (i32, i32) {
    %c0_i32 = arith.constant 0 : i32
    %c0_i32_0 = arith.constant 0 : i32
    return %arg0, %c0_i32 : i32, i32
  }
}

</mosaic_0001>

<bundles_post_ra>
// kernel: tpu_custom_call.1
= control target key start
LH: loop header
LB: loop body
LE: loop exit
PB: predicated region body
PF: predicated region fallthrough
CT: control target
= control target key end

     0   :  { %12 = vsyncpa [#allocation3], 0  ;;  %s567_s0 = inlined_call_operand.vmem [shape: f32[8,4], index: 0, kind: input, shape index: {}]   ;;  %s568_s1 = inlined_call_operand.vmem [shape: f32[4,32], index: 1, kind: input, shape index: {}]   ;;  %s569_s2 = inlined_call_operand.vmem [shape: f32[1,32], index: 2, kind: input, shape index: {}]   ;;  %s570_s3 = inlined_call_operand.hbm [shape: f32[32,32], index: 3, kind: input, shape index: {}]   ;;  %s571_s4 = inlined_call_operand.vmem [shape: f32[1,32], index: 4, kind: input, shape index: {}]   ;;  %s572_s5 = inlined_call_operand.hbm [shape: f32[32,128], index: 5, kind: input, shape index: {}]   ;;  %s573_s6 = inlined_call_operand.vmem [shape: f32[1,128], index: 6, kind: input, shape index: {}]   ;;  %s574_s7 = inlined_call_operand.hbm [shape: f32[8,128], index: 7, kind: output, shape index: {}]  }
   0x1   :  { %13 = vsyncpa [#allocation6], 0 }
   0x2   :  { %14 = vsyncpa [#allocation4], 0  ;;  %s468_s24 = smov [#allocation2]   ;;  %s396_s28 = scalar_lea.hbm %s570_s3, 512 }
   0x3   :  { %s26_s25 = sshll.u32 %s468_s24, 4  ;;  %p397_p0 = scmp.ne.s32.totalorder %s570_s3, %s396_s28  ;;  %s27_s25 = int_to_ptr.vmem [resolvable:$true] %s26_s25 }
   0x4   :  { %p400_p1 = scmp.lt.u32.totalorder %s396_s28, %s570_s3 }
   0x6   :  { %p402_p2 = pnand %p400_p1, %p397_p0 }
   0x8   :  { %405 = shalt.err (!%p402_p2)
}
   0x9   :  { %s406_s10 = scalar_lea.vmem %s27_s25, 512  ;;  %p411_p4 = scmp.lt.s32.totalorder %s27_s25, %s27_s25 }
   0xa   :  { %p407_p3 = scmp.ne.s32.totalorder %s27_s25, %s406_s10  ;;  %p412_p5 = scmp.lt.s32.totalorder %s406_s10, %s406_s10 }
   0xc   :  { %p413_p6 = por %p412_p5, %p411_p4 }
   0xe   :  { %p414_p7 = pnand %p413_p6, %p407_p3 }
  0x10   :  { %417 = shalt.err (!%p414_p7)
}
  0x11   :  { %s469_s11 = smov 128   ;;  %s470_s12 = smov 8  }
  0x12   :  { %32 = dma.hbm_to_vmem [thread:$0]  %s570_s3, 512, %s27_s25, [#allocation3], %s469_s11, %s469_s11, %s470_s12  }
  0x13   :  { %s471_s15 = smov [#allocation5]   ;;  %s418_s19 = scalar_lea.hbm %s572_s5, 512 }
  0x14   :  { %s40_s16 = sshll.u32 %s471_s15, 4  ;;  %p419_p8 = scmp.ne.s32.totalorder %s572_s5, %s418_s19  ;;  %s41_s16 = int_to_ptr.vmem [resolvable:$true] %s40_s16 }
  0x15   :  { %p422_p9 = scmp.lt.u32.totalorder %s418_s19, %s572_s5 }
  0x17   :  { %p424_p10 = pnand %p422_p9, %p419_p8 }
  0x19   :  { %427 = shalt.err (!%p424_p10)
}
  0x1a   :  { %s428_s24 = scalar_lea.vmem %s41_s16, 512  ;;  %p433_p12 = scmp.lt.s32.totalorder %s41_s16, %s41_s16 }
  0x1b   :  { %p429_p11 = scmp.ne.s32.totalorder %s41_s16, %s428_s24  ;;  %p434_p13 = scmp.lt.s32.totalorder %s428_s24, %s428_s24 }
  0x1d   :  { %p435_p0 = por %p434_p13, %p433_p12 }
  0x1f   :  { %p436_p1 = pnand %p435_p0, %p429_p11 }
  0x21   :  { %439 = shalt.err (!%p436_p1)
}
  0x22   :  { %46 = dma.hbm_to_vmem [thread:$0]  %s572_s5, 512, %s41_s16, [#allocation6], %s469_s11, %s469_s11, %s470_s12  }
  0x23   :  { %462 = dma.done.wait [#allocation3], 512  }
  0x24   :  { %463 = vsyncadd [#allocation3], 4294966784 }
  0x25   :  { %464 = dma.done.wait [#allocation6], 512  }
  0x26   :  { %465 = vsyncadd [#allocation6], 4294966784  ;;  %v472_v0 = vmov 0.0   ;;  %vm473_vm0 = vmmov 0   ;;  %v474_v1 = vmov 0.0|0.0   ;;  %vm68_vm1 = vcmask 1043456  }
  0x27   :  { %349 = vmatprep.subr.mxu0 %v472_v0  ;;  %351 = vmatprep.mubr.msk.f32.mxu0 %vm473_vm0, %v472_v0  ;;  %vm64_vm2 = vcmask 31744   ;;  %v56_v2 = vld [vmem:[%s568_s1] sm:$0xf]  ;;  %v144_v5 = vld [vmem:[#allocation2 + $0x8] sm:$0xff]  ;;  %v145_v7 = vld [vmem:[#allocation2 + $0x10] sm:$0xff]  ;;  %vm154_vm3 = vcmask 261120  }
  0x28   :  { %376 = vmatprep.subr.bf16.mxu1 %v474_v1  ;;  %362 = vmatprep.mubr.msk.f32.mxu1 %vm473_vm0, %v472_v0  ;;  %v55_v3 = vld [vmem:[%s567_s0] sm:$0xff]  ;;  %v146_v8 = vld [vmem:[#allocation2 + $0x18] sm:$0xff]  ;;  %v230_v11 = vld [vmem:[#allocation5 + $0x8] sm:$0xff]  ;;  %s475_s9 = smov [#allocation7]  }
  0x29   :  { %v143_v4 = vld [vmem:[#allocation2] sm:$0xff]  ;;  %350 = vmatpush3.msk.msra.mxu0 %vm68_vm1, %v56_v2  ;;  %v380_v9 = vpack.c.bf16 %v146_v8, %v145_v7  ;;  %v231_v18 = vld [vmem:[#allocation5 + $0x10] sm:$0xff]  ;;  %v232_v19 = vld [vmem:[#allocation5 + $0x18] sm:$0xff]  ;;  %s320_s10 = sshll.u32 %s475_s9, 4  ;;  %s321_s10 = int_to_ptr.vmem [resolvable:$true] %s320_s10 }
  0x2a   :  { %352 = vmatmul.mubr.msk.f32.vlgmr.msra.gmra.mrb[0].mxu0 %vm64_vm2, %v55_v3  ;;  %v377_v6 = vpack.c.bf16 %v144_v5, %v143_v4  ;;  %382 = vmatprep.subr.bf16.mxu0 %v474_v1  ;;  %v229_v10 = vld [vmem:[#allocation5] sm:$0xff]  ;;  %v386_v20 = vpack.c.bf16 %v232_v19, %v231_v18  ;;  %s440_s11 = scalar_lea.vmem %s321_s10, 128  ;;  %p445_p3 = scmp.lt.s32.totalorder %s321_s10, %s321_s10 }
  0x2b   :  { %373 = vmatprep.mubr.msk.f32.mxu0 %vm473_vm0, %v472_v0  ;;  %v383_v12 = vpack.c.bf16 %v230_v11, %v229_v10  ;;  %v330_v13 = vld [vmem:[%s569_s2] ss:$0 sm:$0xff]  ;;  %p441_p2 = scmp.ne.s32.totalorder %s321_s10, %s440_s11  ;;  %p446_p4 = scmp.lt.s32.totalorder %s440_s11, %s440_s11 }
  0x2c   :  { %378 = vmatpush3.bf16.msra.mxu1 %v377_v6  ;;  %v333_v21 = vld [vmem:[%s571_s4] ss:$0 sm:$0xff] }
  0x2d   :  { %379 = vmatprep.subr.bf16.mxu1 %v474_v1  ;;  %384 = vmatpush3.bf16.msra.mxu0 %v383_v12  ;;  %v335_v26 = vld [vmem:[%s573_s6] ss:$0 sm:$0xff]  ;;  %p447_p5 = por %p446_p4, %p445_p3 }
  0x2e   :  { %385 = vmatprep.subr.bf16.mxu0 %v474_v1 }
  0x2f   :  { %p448_p6 = pnand %p447_p5, %p441_p2 }
  0x30   :  { %381 = vmatpush3.bf16.msra.mxu1 %v380_v9 }
  0x31   :  { %387 = vmatpush3.bf16.msra.mxu0 %v386_v20 }
  0xfd   :  { %v138_v14 = vpop.f32.mrb[0].mxu0 }
  0xfe   :  { %v139_v15 = vadd.f32 %v330_v13, %v138_v14  ;;  %v353_v16 = vpop.f32.mrb[1].mxu0 }
 0x100   :  { %v142_v17 = vmax.f32 %v139_v15, 0.0 }
 0x102   :  { %363 = vmatmul.mubr.msk.f32.vlgmr.msra.gmra.mrb[0].mxu1 %vm154_vm3, %v142_v17 }
 0x1d5   :  { %v224_v22 = vpop.f32.mrb[0].mxu1 }
 0x1d6   :  { %v225_v23 = vadd.f32 %v333_v21, %v224_v22  ;;  %v364_v24 = vpop.f32.mrb[1].mxu1 }
 0x1d8   :  { %v228_v25 = vmax.f32 %v225_v23, 0.0 }
 0x1da   :  { %374 = vmatmul.mubr.msk.f32.vlgmr.msra.gmra.mrb[2].mxu0 %vm154_vm3, %v228_v25 }
 0x2ad   :  { %v309_v27 = vpop.f32.mrb[2].mxu0 }
 0x2ae   :  { %v310_v28 = vadd.f32 %v335_v26, %v309_v27  ;;  %v375_v29 = vpop.f32.mrb[3].mxu0 }
 0x2b0   :  { %313 = vst [vmem:[#allocation7] sm:$0xff] %v310_v28 }
 0x2b1   :  { %451 = shalt.err (!%p448_p6)
}
 0x2b2   :  { %s452_s13 = scalar_lea.hbm %s574_s7, 128 }
 0x2b3   :  { %p453_p7 = scmp.ne.s32.totalorder %s574_s7, %s452_s13  ;;  %p456_p8 = scmp.lt.u32.totalorder %s452_s13, %s574_s7 }
 0x2b5   :  { %p458_p9 = pnand %p456_p8, %p453_p7 }
 0x2b7   :  { %461 = shalt.err (!%p458_p9)
}
 0x2b8   :  { %323 = dma.vmem_to_hbm [thread:$0]  %s321_s10, 128, %s574_s7, [#allocation4]  }
 0x2b9   :  { %466 = dma.done.wait [#allocation4], 128  }
 0x2ba   :  { %467 = vsyncadd [#allocation4], 4294967168 }
 0x2bb   :  { %327 = vsyncpa [#allocation3], 1 }
 0x2bc   :  { %328 = vsyncpa [#allocation6], 1 }
 0x2bd   :  { %329 = vsyncpa [#allocation4], 1 }

</bundles_post_ra>
